<compile_context>
chip_gen: v6e
topology: v6e:2x2x1
jax: 0.10.0
libtpu: 0.0.40
codegen_flags: <defaults>
</compile_context>

<pallas_src>
import jax
import jax.numpy as jnp
from jax.experimental import pallas as pl
from jax.experimental.pallas import tpu as pltpu


def _round_up(n, m):
    return ((n + m - 1) // m) * m


def _make_double_conv_kernel(H, W, pad_l, pad_r):
    HW = H * W
    P = pad_l + HW + pad_r
    base = pad_l - (W + 1)          # lane offset of tap (dy=0, dx=0)

    def conv3x3_relu(src_ref, mask_ref, w_ref, b_ref):
        # src_ref : (C, P)  f32 padded-flat source (halo lanes are zero)
        # mask_ref: (2, HW) f32; row 0: output col != 0, row 1: output col != W-1
        # w_ref   : (C_out, 9*C) bf16 packed weights, columns tap-major
        # b_ref   : (C_out, 1) f32
        taps = []
        for dy in range(3):
            for dx in range(3):
                o = base + dy * W + dx                 # static lane offset
                t = src_ref[:, o:o + HW]               # (C, HW) f32 load
                if dx == 0:                            # left-neighbour tap
                    t = t * mask_ref[0:1, :]           # kill horizontal wrap
                elif dx == 2:                          # right-neighbour tap
                    t = t * mask_ref[1:2, :]
                taps.append(t)
        patches = jnp.concatenate(taps, axis=0)        # (9*C, HW) f32
        acc = jnp.dot(w_ref[...], patches.astype(jnp.bfloat16),
                      preferred_element_type=jnp.float32)   # one MXU matmul
        return jnp.maximum(acc + b_ref[...], 0.0)      # bias + ReLU, f32

    def kernel(x_ref, w1_ref, b1_ref, w2_ref, b2_ref, mask_ref,
               out_ref, xpad_ref, hpad_ref):
        c_in = xpad_ref.shape[0]
        c_mid = hpad_ref.shape[0]

        # Zero only the halo lanes (data region is fully overwritten below).
        # Done every grid step so correctness does not depend on which core
        # executes step 0 when the "parallel" batch axis is megacore-sharded.
        xpad_ref[:, :pad_l] = jnp.zeros((c_in, pad_l), jnp.float32)
        xpad_ref[:, pad_l + HW:] = jnp.zeros((c_in, pad_r), jnp.float32)
        hpad_ref[:, :pad_l] = jnp.zeros((c_mid, pad_l), jnp.float32)
        hpad_ref[:, pad_l + HW:] = jnp.zeros((c_mid, pad_r), jnp.float32)

        # Stage the (unpadded) input into the lane-aligned padded-flat layout.
        xpad_ref[:, pad_l:pad_l + HW] = x_ref[...].astype(jnp.float32)

        # Layer 1: conv + ReLU; intermediate stays in VMEM (no HBM round-trip).
        h = conv3x3_relu(xpad_ref, mask_ref, w1_ref, b1_ref)   # (C_mid, HW)
        hpad_ref[:, pad_l:pad_l + HW] = h

        # Layer 2: conv + ReLU.
        y = conv3x3_relu(hpad_ref, mask_ref, w2_ref, b2_ref)   # (C_out, HW)
        out_ref[...] = y.astype(out_ref.dtype)

    return kernel


def double_convolution_pallas(x, w1, w2, b1=None, b2=None):
    """x: (B, C_in, H, W); w1: (C_mid, C_in, 3, 3); w2: (C_out, C_mid, 3, 3)."""
    B, C_in, H, W = x.shape
    C_mid = w1.shape[0]
    C_out = w2.shape[0]
    HW = H * W

    # Lane-aligned halo: left pad rounded up to 128 lanes so staging stores and
    # centre-tap reloads are aligned; P stays a multiple of 128.
    pad_l = _round_up(W + 1, 128)
    pad_r = _round_up(W + 1, 128)
    P = pad_l + HW + pad_r

    # Metadata-only reshape; no padding / dtype pass over x in the wrapper.
    xflat = x.reshape(B, C_in, HW)

    # Column masks (output coordinates) killing horizontal wrap of flat shifts.
    col = jnp.arange(HW, dtype=jnp.int32) % W
    masks = jnp.stack([(col != 0), (col != W - 1)], axis=0).astype(jnp.float32)

    # Pack weights as (C_out, 9*C_in), columns ordered tap-major to match the
    # patch stack: column (dy*3+dx)*C_in + ci  <-  w[co, ci, dy, dx].  bf16.
    def pack(w):
        O, I = w.shape[0], w.shape[1]
        return jnp.transpose(w, (0, 2, 3, 1)).reshape(O, 9 * I).astype(jnp.bfloat16)

    w1_p = pack(w1)
    w2_p = pack(w2)

    b1_col = (jnp.zeros((C_mid,), jnp.float32) if b1 is None
              else b1.astype(jnp.float32)).reshape(C_mid, 1)
    b2_col = (jnp.zeros((C_out,), jnp.float32) if b2 is None
              else b2.astype(jnp.float32)).reshape(C_out, 1)

    kernel = _make_double_conv_kernel(H, W, pad_l, pad_r)

    out = pl.pallas_call(
        kernel,
        out_shape=jax.ShapeDtypeStruct((B, C_out, HW), jnp.float32),
        grid_spec=pltpu.PrefetchScalarGridSpec(
            num_scalar_prefetch=0,
            grid=(B,),
            in_specs=[
                pl.BlockSpec((None, C_in, HW), lambda b: (b, 0, 0)),     # x
                pl.BlockSpec((C_mid, 9 * C_in), lambda b: (0, 0)),       # w1
                pl.BlockSpec((C_mid, 1), lambda b: (0, 0)),              # b1
                pl.BlockSpec((C_out, 9 * C_mid), lambda b: (0, 0)),      # w2
                pl.BlockSpec((C_out, 1), lambda b: (0, 0)),              # b2
                pl.BlockSpec((2, HW), lambda b: (0, 0)),                 # masks
            ],
            out_specs=pl.BlockSpec((None, C_out, HW), lambda b: (b, 0, 0)),
            scratch_shapes=[
                pltpu.VMEM((C_in, P), jnp.float32),    # padded-flat input
                pltpu.VMEM((C_mid, P), jnp.float32),   # padded-flat intermediate
            ],
        ),
        compiler_params=pltpu.CompilerParams(
            dimension_semantics=("parallel",)),
    )(xflat, w1_p, b1_col, w2_p, b2_col, masks)

    return out.reshape(B, C_out, H, W)


def double_convolution_ref(x, w1, b1, w2, b2):
    """Pure-JAX reference matching the PyTorch forward (optional bias, ReLU)."""
    def conv(inp, w, b):
        out = jax.lax.conv_general_dilated(
            inp, w, window_strides=(1, 1), padding="SAME",
            dimension_numbers=("NCHW", "OIHW", "NCHW"),
            precision=jax.lax.Precision.HIGHEST)
        if b is not None:
            out = out + b[None, :, None, None]
        return out
    h = jnp.maximum(conv(x, w1, b1), 0.0)
    return jnp.maximum(conv(h, w2, b2), 0.0)


if __name__ == "__main__":
    B, C_in, C_mid, C_out, H, W = 2, 8, 16, 8, 16, 16

    key = jax.random.PRNGKey(0)
    k1, k2, k3 = jax.random.split(key, 3)

    x = jax.random.normal(k1, (B, C_in, H, W), dtype=jnp.float32)
    w1 = jax.random.normal(k2, (C_mid, C_in, 3, 3), dtype=jnp.float32) * 0.1
    w2 = jax.random.normal(k3, (C_out, C_mid, 3, 3), dtype=jnp.float32) * 0.1

    out = double_convolution_pallas(x, w1, w2)   # bias=False (module default)
    out = jax.block_until_ready(out)

    ref = double_convolution_ref(x, w1, None, w2, None)
    assert out.shape == ref.shape == (B, C_out, H, W)
    # bf16 MXU operands vs f32 HIGHEST-precision reference -> relaxed tolerance.
    rel_err = float(jnp.max(jnp.abs(out - ref)) / (jnp.max(jnp.abs(ref)) + 1e-6))
    assert rel_err < 5e-2, f"mismatch vs reference: rel_err={rel_err}"

    print("KERNEL_OK")
</pallas_src>

<mosaic_0001>
module attributes {stable_mosaic.version = 11 : i64} {
  func.func @kernel(%arg0: i32, %arg1: memref<1x8x256xf32, #tpu.memory_space<vmem>>, %arg2: memref<16x72xbf16, #tpu.memory_space<vmem>>, %arg3: memref<16x1xf32, #tpu.memory_space<vmem>>, %arg4: memref<8x144xbf16, #tpu.memory_space<vmem>>, %arg5: memref<8x1xf32, #tpu.memory_space<vmem>>, %arg6: memref<2x256xf32, #tpu.memory_space<vmem>>, %arg7: memref<1x8x256xf32, #tpu.memory_space<vmem>>, %arg8: memref<8x512xf32, #tpu.memory_space<vmem>>, %arg9: memref<16x512xf32, #tpu.memory_space<vmem>>) attributes {dimension_semantics = [#tpu.dimension_semantics<parallel>], iteration_bounds = array<i64: 2>, scalar_prefetch = 0 : i64, scratch_operands = 2 : i64, tpu.core_type = #tpu.core_type<tc>, window_params = [{transform_indices = @transform_0, window_bounds = array<i64: 1, 8, 256>}, {pipeline_mode = #tpu.pipeline_mode<synchronous>, transform_indices = @transform_1, window_bounds = array<i64: 16, 72>}, {pipeline_mode = #tpu.pipeline_mode<synchronous>, transform_indices = @transform_2, window_bounds = array<i64: 16, 1>}, {pipeline_mode = #tpu.pipeline_mode<synchronous>, transform_indices = @transform_3, window_bounds = array<i64: 8, 144>}, {pipeline_mode = #tpu.pipeline_mode<synchronous>, transform_indices = @transform_4, window_bounds = array<i64: 8, 1>}, {pipeline_mode = #tpu.pipeline_mode<synchronous>, transform_indices = @transform_5, window_bounds = array<i64: 2, 256>}, {transform_indices = @transform_6, window_bounds = array<i64: 1, 8, 256>}]} {
    %cst = arith.constant 0.000000e+00 : f32
    %0 = vector.broadcast %cst : f32 to vector<8x128xf32>
    %c0 = arith.constant 0 : index
    %c0_0 = arith.constant 0 : index
    %1 = vector.load %arg8[%c0, %c0_0] : memref<8x512xf32, #tpu.memory_space<vmem>>, vector<8x128xf32>
    tpu.vector_store %arg8[%c0, %c0_0], %0 {strides = array<i32>} : memref<8x512xf32, #tpu.memory_space<vmem>>, vector<8x128xf32>,
    %cst_1 = arith.constant 0.000000e+00 : f32
    %2 = vector.broadcast %cst_1 : f32 to vector<8x128xf32>
    %c0_2 = arith.constant 0 : index
    %c384 = arith.constant 384 : index
    %3 = vector.load %arg8[%c0_2, %c384] : memref<8x512xf32, #tpu.memory_space<vmem>>, vector<8x128xf32>
    tpu.vector_store %arg8[%c0_2, %c384], %2 {strides = array<i32>} : memref<8x512xf32, #tpu.memory_space<vmem>>, vector<8x128xf32>,
    %cst_3 = arith.constant 0.000000e+00 : f32
    %4 = vector.broadcast %cst_3 : f32 to vector<16x128xf32>
    %c0_4 = arith.constant 0 : index
    %c0_5 = arith.constant 0 : index
    %5 = vector.load %arg9[%c0_4, %c0_5] : memref<16x512xf32, #tpu.memory_space<vmem>>, vector<16x128xf32>
    tpu.vector_store %arg9[%c0_4, %c0_5], %4 {strides = array<i32>} : memref<16x512xf32, #tpu.memory_space<vmem>>, vector<16x128xf32>,
    %cst_6 = arith.constant 0.000000e+00 : f32
    %6 = vector.broadcast %cst_6 : f32 to vector<16x128xf32>
    %c0_7 = arith.constant 0 : index
    %c384_8 = arith.constant 384 : index
    %7 = vector.load %arg9[%c0_7, %c384_8] : memref<16x512xf32, #tpu.memory_space<vmem>>, vector<16x128xf32>
    tpu.vector_store %arg9[%c0_7, %c384_8], %6 {strides = array<i32>} : memref<16x512xf32, #tpu.memory_space<vmem>>, vector<16x128xf32>,
    %c0_9 = arith.constant 0 : index
    %c0_10 = arith.constant 0 : index
    %c0_11 = arith.constant 0 : index
    %8 = vector.load %arg1[%c0_9, %c0_10, %c0_11] : memref<1x8x256xf32, #tpu.memory_space<vmem>>, vector<1x8x256xf32>
    %9 = vector.shape_cast %8 : vector<1x8x256xf32> to vector<8x256xf32>
    %c0_12 = arith.constant 0 : index
    %c128 = arith.constant 128 : index
    %10 = vector.load %arg8[%c0_12, %c128] : memref<8x512xf32, #tpu.memory_space<vmem>>, vector<8x256xf32>
    tpu.vector_store %arg8[%c0_12, %c128], %9 {strides = array<i32>} : memref<8x512xf32, #tpu.memory_space<vmem>>, vector<8x256xf32>,
    %c0_13 = arith.constant 0 : index
    %c111 = arith.constant 111 : index
    %11 = vector.load %arg8[%c0_13, %c111] : memref<8x512xf32, #tpu.memory_space<vmem>>, vector<8x256xf32>
    %c0_14 = arith.constant 0 : index
    %c0_15 = arith.constant 0 : index
    %12 = vector.load %arg6[%c0_14, %c0_15] : memref<2x256xf32, #tpu.memory_space<vmem>>, vector<1x256xf32>
    %13 = vector.broadcast %12 : vector<1x256xf32> to vector<8x256xf32>
    %14 = arith.mulf %11, %13 : vector<8x256xf32>
    %c0_16 = arith.constant 0 : index
    %c112 = arith.constant 112 : index
    %15 = vector.load %arg8[%c0_16, %c112] : memref<8x512xf32, #tpu.memory_space<vmem>>, vector<8x256xf32>
    %c0_17 = arith.constant 0 : index
    %c113 = arith.constant 113 : index
    %16 = vector.load %arg8[%c0_17, %c113] : memref<8x512xf32, #tpu.memory_space<vmem>>, vector<8x256xf32>
    %c1 = arith.constant 1 : index
    %c0_18 = arith.constant 0 : index
    %17 = vector.load %arg6[%c1, %c0_18] : memref<2x256xf32, #tpu.memory_space<vmem>>, vector<1x256xf32>
    %18 = vector.broadcast %17 : vector<1x256xf32> to vector<8x256xf32>
    %19 = arith.mulf %16, %18 : vector<8x256xf32>
    %c0_19 = arith.constant 0 : index
    %c127 = arith.constant 127 : index
    %20 = vector.load %arg8[%c0_19, %c127] : memref<8x512xf32, #tpu.memory_space<vmem>>, vector<8x256xf32>
    %c0_20 = arith.constant 0 : index
    %c0_21 = arith.constant 0 : index
    %21 = vector.load %arg6[%c0_20, %c0_21] : memref<2x256xf32, #tpu.memory_space<vmem>>, vector<1x256xf32>
    %22 = vector.broadcast %21 : vector<1x256xf32> to vector<8x256xf32>
    %23 = arith.mulf %20, %22 : vector<8x256xf32>
    %c0_22 = arith.constant 0 : index
    %c128_23 = arith.constant 128 : index
    %24 = vector.load %arg8[%c0_22, %c128_23] : memref<8x512xf32, #tpu.memory_space<vmem>>, vector<8x256xf32>
    %c0_24 = arith.constant 0 : index
    %c129 = arith.constant 129 : index
    %25 = vector.load %arg8[%c0_24, %c129] : memref<8x512xf32, #tpu.memory_space<vmem>>, vector<8x256xf32>
    %c1_25 = arith.constant 1 : index
    %c0_26 = arith.constant 0 : index
    %26 = vector.load %arg6[%c1_25, %c0_26] : memref<2x256xf32, #tpu.memory_space<vmem>>, vector<1x256xf32>
    %27 = vector.broadcast %26 : vector<1x256xf32> to vector<8x256xf32>
    %28 = arith.mulf %25, %27 : vector<8x256xf32>
    %c0_27 = arith.constant 0 : index
    %c143 = arith.constant 143 : index
    %29 = vector.load %arg8[%c0_27, %c143] : memref<8x512xf32, #tpu.memory_space<vmem>>, vector<8x256xf32>
    %c0_28 = arith.constant 0 : index
    %c0_29 = arith.constant 0 : index
    %30 = vector.load %arg6[%c0_28, %c0_29] : memref<2x256xf32, #tpu.memory_space<vmem>>, vector<1x256xf32>
    %31 = vector.broadcast %30 : vector<1x256xf32> to vector<8x256xf32>
    %32 = arith.mulf %29, %31 : vector<8x256xf32>
    %c0_30 = arith.constant 0 : index
    %c144 = arith.constant 144 : index
    %33 = vector.load %arg8[%c0_30, %c144] : memref<8x512xf32, #tpu.memory_space<vmem>>, vector<8x256xf32>
    %c0_31 = arith.constant 0 : index
    %c145 = arith.constant 145 : index
    %34 = vector.load %arg8[%c0_31, %c145] : memref<8x512xf32, #tpu.memory_space<vmem>>, vector<8x256xf32>
    %c1_32 = arith.constant 1 : index
    %c0_33 = arith.constant 0 : index
    %35 = vector.load %arg6[%c1_32, %c0_33] : memref<2x256xf32, #tpu.memory_space<vmem>>, vector<1x256xf32>
    %36 = vector.broadcast %35 : vector<1x256xf32> to vector<8x256xf32>
    %37 = arith.mulf %34, %36 : vector<8x256xf32>
    %38 = tpu.concatenate %14, %15, %19, %23, %24, %28, %32, %33, %37 in 0 : vector<8x256xf32>, vector<8x256xf32>, vector<8x256xf32>, vector<8x256xf32>, vector<8x256xf32>, vector<8x256xf32>, vector<8x256xf32>, vector<8x256xf32>, vector<8x256xf32> -> vector<72x256xf32>
    %c0_34 = arith.constant 0 : index
    %c0_35 = arith.constant 0 : index
    %39 = vector.load %arg2[%c0_34, %c0_35] : memref<16x72xbf16, #tpu.memory_space<vmem>>, vector<16x72xbf16>
    %40 = arith.truncf %38 : vector<72x256xf32> to vector<72x256xbf16>
    %cst_36 = arith.constant dense<0.000000e+00> : vector<16x256xf32>
    %41 = tpu.matmul %39, %40, %cst_36 {dimension_numbers = #tpu.dot_dimension_numbers<[1], [0], [0], [1], [0, 0, 1, 1], [], []>} : vector<16x72xbf16>, vector<72x256xbf16>, vector<16x256xf32> -> vector<16x256xf32>
    %c0_37 = arith.constant 0 : index
    %c0_38 = arith.constant 0 : index
    %42 = vector.load %arg3[%c0_37, %c0_38] : memref<16x1xf32, #tpu.memory_space<vmem>>, vector<16x1xf32>
    %43 = vector.broadcast %42 : vector<16x1xf32> to vector<16x256xf32>
    %44 = arith.addf %41, %43 : vector<16x256xf32>
    %cst_39 = arith.constant 0.000000e+00 : f32
    %45 = vector.broadcast %cst_39 : f32 to vector<16x256xf32>
    %46 = arith.maximumf %44, %45 : vector<16x256xf32>
    %c0_40 = arith.constant 0 : index
    %c128_41 = arith.constant 128 : index
    %47 = vector.load %arg9[%c0_40, %c128_41] : memref<16x512xf32, #tpu.memory_space<vmem>>, vector<16x256xf32>
    tpu.vector_store %arg9[%c0_40, %c128_41], %46 {strides = array<i32>} : memref<16x512xf32, #tpu.memory_space<vmem>>, vector<16x256xf32>,
    %c0_42 = arith.constant 0 : index
    %c111_43 = arith.constant 111 : index
    %48 = vector.load %arg9[%c0_42, %c111_43] : memref<16x512xf32, #tpu.memory_space<vmem>>, vector<16x256xf32>
    %c0_44 = arith.constant 0 : index
    %c0_45 = arith.constant 0 : index
    %49 = vector.load %arg6[%c0_44, %c0_45] : memref<2x256xf32, #tpu.memory_space<vmem>>, vector<1x256xf32>
    %50 = vector.broadcast %49 : vector<1x256xf32> to vector<16x256xf32>
    %51 = arith.mulf %48, %50 : vector<16x256xf32>
    %c0_46 = arith.constant 0 : index
    %c112_47 = arith.constant 112 : index
    %52 = vector.load %arg9[%c0_46, %c112_47] : memref<16x512xf32, #tpu.memory_space<vmem>>, vector<16x256xf32>
    %c0_48 = arith.constant 0 : index
    %c113_49 = arith.constant 113 : index
    %53 = vector.load %arg9[%c0_48, %c113_49] : memref<16x512xf32, #tpu.memory_space<vmem>>, vector<16x256xf32>
    %c1_50 = arith.constant 1 : index
    %c0_51 = arith.constant 0 : index
    %54 = vector.load %arg6[%c1_50, %c0_51] : memref<2x256xf32, #tpu.memory_space<vmem>>, vector<1x256xf32>
    %55 = vector.broadcast %54 : vector<1x256xf32> to vector<16x256xf32>
    %56 = arith.mulf %53, %55 : vector<16x256xf32>
    %c0_52 = arith.constant 0 : index
    %c127_53 = arith.constant 127 : index
    %57 = vector.load %arg9[%c0_52, %c127_53] : memref<16x512xf32, #tpu.memory_space<vmem>>, vector<16x256xf32>
    %c0_54 = arith.constant 0 : index
    %c0_55 = arith.constant 0 : index
    %58 = vector.load %arg6[%c0_54, %c0_55] : memref<2x256xf32, #tpu.memory_space<vmem>>, vector<1x256xf32>
    %59 = vector.broadcast %58 : vector<1x256xf32> to vector<16x256xf32>
    %60 = arith.mulf %57, %59 : vector<16x256xf32>
    %c0_56 = arith.constant 0 : index
    %c128_57 = arith.constant 128 : index
    %61 = vector.load %arg9[%c0_56, %c128_57] : memref<16x512xf32, #tpu.memory_space<vmem>>, vector<16x256xf32>
    %c0_58 = arith.constant 0 : index
    %c129_59 = arith.constant 129 : index
    %62 = vector.load %arg9[%c0_58, %c129_59] : memref<16x512xf32, #tpu.memory_space<vmem>>, vector<16x256xf32>
    %c1_60 = arith.constant 1 : index
    %c0_61 = arith.constant 0 : index
    %63 = vector.load %arg6[%c1_60, %c0_61] : memref<2x256xf32, #tpu.memory_space<vmem>>, vector<1x256xf32>
    %64 = vector.broadcast %63 : vector<1x256xf32> to vector<16x256xf32>
    %65 = arith.mulf %62, %64 : vector<16x256xf32>
    %c0_62 = arith.constant 0 : index
    %c143_63 = arith.constant 143 : index
    %66 = vector.load %arg9[%c0_62, %c143_63] : memref<16x512xf32, #tpu.memory_space<vmem>>, vector<16x256xf32>
    %c0_64 = arith.constant 0 : index
    %c0_65 = arith.constant 0 : index
    %67 = vector.load %arg6[%c0_64, %c0_65] : memref<2x256xf32, #tpu.memory_space<vmem>>, vector<1x256xf32>
    %68 = vector.broadcast %67 : vector<1x256xf32> to vector<16x256xf32>
    %69 = arith.mulf %66, %68 : vector<16x256xf32>
    %c0_66 = arith.constant 0 : index
    %c144_67 = arith.constant 144 : index
    %70 = vector.load %arg9[%c0_66, %c144_67] : memref<16x512xf32, #tpu.memory_space<vmem>>, vector<16x256xf32>
    %c0_68 = arith.constant 0 : index
    %c145_69 = arith.constant 145 : index
    %71 = vector.load %arg9[%c0_68, %c145_69] : memref<16x512xf32, #tpu.memory_space<vmem>>, vector<16x256xf32>
    %c1_70 = arith.constant 1 : index
    %c0_71 = arith.constant 0 : index
    %72 = vector.load %arg6[%c1_70, %c0_71] : memref<2x256xf32, #tpu.memory_space<vmem>>, vector<1x256xf32>
    %73 = vector.broadcast %72 : vector<1x256xf32> to vector<16x256xf32>
    %74 = arith.mulf %71, %73 : vector<16x256xf32>
    %75 = tpu.concatenate %51, %52, %56, %60, %61, %65, %69, %70, %74 in 0 : vector<16x256xf32>, vector<16x256xf32>, vector<16x256xf32>, vector<16x256xf32>, vector<16x256xf32>, vector<16x256xf32>, vector<16x256xf32>, vector<16x256xf32>, vector<16x256xf32> -> vector<144x256xf32>
    %c0_72 = arith.constant 0 : index
    %c0_73 = arith.constant 0 : index
    %76 = vector.load %arg4[%c0_72, %c0_73] : memref<8x144xbf16, #tpu.memory_space<vmem>>, vector<8x144xbf16>
    %77 = arith.truncf %75 : vector<144x256xf32> to vector<144x256xbf16>
    %cst_74 = arith.constant dense<0.000000e+00> : vector<8x256xf32>
    %78 = tpu.matmul %76, %77, %cst_74 {dimension_numbers = #tpu.dot_dimension_numbers<[1], [0], [0], [1], [0, 0, 1, 1], [], []>} : vector<8x144xbf16>, vector<144x256xbf16>, vector<8x256xf32> -> vector<8x256xf32>
    %c0_75 = arith.constant 0 : index
    %c0_76 = arith.constant 0 : index
    %79 = vector.load %arg5[%c0_75, %c0_76] : memref<8x1xf32, #tpu.memory_space<vmem>>, vector<8x1xf32>
    %80 = vector.broadcast %79 : vector<8x1xf32> to vector<8x256xf32>
    %81 = arith.addf %78, %80 : vector<8x256xf32>
    %cst_77 = arith.constant 0.000000e+00 : f32
    %82 = vector.broadcast %cst_77 : f32 to vector<8x256xf32>
    %83 = arith.maximumf %81, %82 : vector<8x256xf32>
    %c0_78 = arith.constant 0 : index
    %c0_79 = arith.constant 0 : index
    %c0_80 = arith.constant 0 : index
    %84 = vector.load %arg7[%c0_78, %c0_79, %c0_80] : memref<1x8x256xf32, #tpu.memory_space<vmem>>, vector<1x8x256xf32>
    %85 = vector.shape_cast %84 : vector<1x8x256xf32> to vector<8x256xf32>
    %86 = vector.shape_cast %83 : vector<8x256xf32> to vector<1x8x256xf32>
    tpu.vector_store %arg7[%c0_78, %c0_79, %c0_80], %86 {strides = array<i32>} : memref<1x8x256xf32, #tpu.memory_space<vmem>>, vector<1x8x256xf32>,
    return
  }
  func.func @transform_0(%arg0: i32) -> (i32, i32, i32) {
    %c0_i32 = arith.constant 0 : i32
    %c0_i32_0 = arith.constant 0 : i32
    %c0_i32_1 = arith.constant 0 : i32
    return %arg0, %c0_i32, %c0_i32_0 : i32, i32, i32
  }
  func.func @transform_1(%arg0: i32) -> (i32, i32) {
    %c0_i32 = arith.constant 0 : i32
    %c0_i32_0 = arith.constant 0 : i32
    %c0_i32_1 = arith.constant 0 : i32
    return %c0_i32, %c0_i32_0 : i32, i32
  }
  func.func @transform_2(%arg0: i32) -> (i32, i32) {
    %c0_i32 = arith.constant 0 : i32
    %c0_i32_0 = arith.constant 0 : i32
    %c0_i32_1 = arith.constant 0 : i32
    return %c0_i32, %c0_i32_0 : i32, i32
  }
  func.func @transform_3(%arg0: i32) -> (i32, i32) {
    %c0_i32 = arith.constant 0 : i32
    %c0_i32_0 = arith.constant 0 : i32
    %c0_i32_1 = arith.constant 0 : i32
    return %c0_i32, %c0_i32_0 : i32, i32
  }
  func.func @transform_4(%arg0: i32) -> (i32, i32) {
    %c0_i32 = arith.constant 0 : i32
    %c0_i32_0 = arith.constant 0 : i32
    %c0_i32_1 = arith.constant 0 : i32
    return %c0_i32, %c0_i32_0 : i32, i32
  }
  func.func @transform_5(%arg0: i32) -> (i32, i32) {
    %c0_i32 = arith.constant 0 : i32
    %c0_i32_0 = arith.constant 0 : i32
    %c0_i32_1 = arith.constant 0 : i32
    return %c0_i32, %c0_i32_0 : i32, i32
  }
  func.func @transform_6(%arg0: i32) -> (i32, i32, i32) {
    %c0_i32 = arith.constant 0 : i32
    %c0_i32_0 = arith.constant 0 : i32
    %c0_i32_1 = arith.constant 0 : i32
    return %arg0, %c0_i32, %c0_i32_0 : i32, i32, i32
  }
}

</mosaic_0001>

<bundles_post_ra>
// kernel: tpu_custom_call.1
= control target key start
LH: loop header
LB: loop body
LE: loop exit
PB: predicated region body
PF: predicated region fallthrough
CT: control target
= control target key end

     0   :  { %11 = vsyncpa [#allocation5], 0  ;;  %s2173_s0 = inlined_call_operand.hbm [shape: f32[2,8,256], index: 0, kind: input, shape index: {}]   ;;  %s2174_s1 = inlined_call_operand.vmem [shape: bf16[16,72], index: 1, kind: input, shape index: {}]   ;;  %s2175_s2 = inlined_call_operand.vmem [shape: f32[16,1], index: 2, kind: input, shape index: {}]   ;;  %s2176_s3 = inlined_call_operand.vmem [shape: bf16[8,144], index: 3, kind: input, shape index: {}]   ;;  %s2177_s4 = inlined_call_operand.vmem [shape: f32[8,1], index: 4, kind: input, shape index: {}]   ;;  %s2178_s5 = inlined_call_operand.vmem [shape: f32[2,256], index: 5, kind: input, shape index: {}]   ;;  %s2179_s6 = inlined_call_operand.hbm [shape: f32[2,8,256], index: 6, kind: output, shape index: {}]  }
   0x1   :  { %13 = vsyncpa [#allocation5 + $0x1], 0 }
   0x2   :  { %14 = vsyncpa [#allocation6], 0 }
   0x3   :  { %16 = vsyncpa [#allocation6 + $0x1], 0  ;;  %s1658_s21 = smov 0   ;;  %s1660_s22 = smov 0  }
   0x4   :  { %s1662_s23 = smov 0   ;;  %s1664_s24 = smov 0  }
   0x5 LB: > { %s1679_s25 = sadd.s32 4294967295, %s1605_s24   ;;  %s1269_s26 = sadd.s32 4294967294, %s1605_s24   ;;  %s1605_s24 = sphi %s1664_s24, %s2216_s24   ;;  %s1601_s23 = sphi %s1662_s23, %s2215_s23   ;;  %s1597_s22 = sphi %s1660_s22, %s2214_s22   ;;  %s1593_s21 = sphi %s1658_s21, %s2213_s21  }
   0x6   : > { %s1683_s27 = sadd.s32 1, %s1605_s24   ;;  %s29_s28 = sadd.s32 1, %s1601_s23 }
   0x7   : > { %s26_s29 = ssub.s32 %s1605_s24, %s1683_s27  ;;  %p36_p0 = scmp.ne.s32.totalorder %s1601_s23, %s1597_s22 }
   0x8   : > { %p27_p1 = scmp.eq.s32.totalorder %s26_s29, 0  ;;  %p37_p2 = scmp.eq.s32.totalorder %s1605_s24, 0 }
   0x9   : > { %p42_p3 = scmp.ne.s32.totalorder %s1597_s22, %s1593_s21  ;;  %p43_p4 = scmp.eq.s32.totalorder %s1679_s25, 0 }
   0xa   : > { %s1695_s30 = scalar_select %p27_p1, %s1601_s23, %s29_s28  }
   0xb   : > { %p1697_p5 = por %p37_p2, %p36_p0  ;;  %p1701_p6 = por %p43_p4, %p42_p3 }
   0xc   : > { %p171_p7 = scmp.eq.s32.totalorder %s1679_s25, 1  ;;  %p177_p8 = scmp.eq.s32.totalorder %s1269_s26, 1 }
   0xd   : > { %s2196_s8 = scalar_select %p1701_p6, 1, 0 }
   0xe   : > { %p1305_p10 = scmp.lt.s32.totalorder %s1605_s24, 2  ;;  %p1708_p11 = por %p171_p7, %p36_p0 }
   0xf   : > { %p1712_p12 = por %p177_p8, %p42_p3  ;;  %s212_s11 = sand.u32 1, %s1601_s23  }
  0x10   : > { %s2197_s9 = scalar_select %p1708_p11, 1, 0 }
  0x11   : > { %s2198_s10 = scalar_select %p1712_p12, 1, 0 }
  0x12   : > { %s1291_s12 = sshll.u32 %s1605_s24, 8  ;;  %s1272_s13 = sshll.u32 %s212_s11, 4 }
  0x13   : > { %s1721_s16 = scalar_lea.hbm %s2173_s0, %s1291_s12  ;;  %s216_s17 = scalar_lea.vmem [#allocation4], %s1272_s13 }
  0x14   : > { %s224_s18 = sshll.u32 %s216_s17, 4  ;;  %p1725_p13 = pnand %p1305_p10, %p1697_p5  ;;  %s1729_s18 = int_to_ptr.vmem [resolvable:$true] %s224_s18 }
  0x15   : > { %s213_s20 = scalar_lea.sflag [#allocation5], %s212_s11  ;;  %s1513_s26 = scalar_lea.hbm %s1721_s16, 256 }
  0x16   : > { %p1514_p2 = scmp.ne.s32.totalorder %s1721_s16, %s1513_s26  ;;  %p1515_p3 = pneg %p1725_p13 }
  0x17   : > { %s1518_s7 = scalar_lea.hbm %s2173_s0, 512  ;;  %p1519_p5 = scmp.lt.s32.totalorder %s1721_s16, %s2173_s0 }
  0x18   : > { %p1516_p4 = pnand %p1515_p3, %p1514_p2  ;;  %p1520_p8 = scmp.lt.s32.totalorder %s1518_s7, %s1513_s26 }
  0x1a   : > { %p1517_p7 = pneg %p1516_p4  ;;  %p1521_p10 = por %p1520_p8, %p1519_p5 }
  0x1c   : > { %p1522_p9 = pnand %p1521_p10, %p1517_p7 }
  0x1e   : > { %1525 = shalt.err (!%p1522_p9)
}
  0x1f   : > { %s1526_s11 = scalar_lea.vmem %s1729_s18, 256  ;;  %s1607_s14 = smov [#allocation4]  }
  0x20   : > { %p1527_p0 = scmp.ne.s32.totalorder %s1729_s18, %s1526_s11  ;;  %s1531_s15 = sshll.u32 %s1607_s14, 4  ;;  %s1532_s15 = int_to_ptr.vmem [resolvable:$false] %s1531_s15 }
  0x21   : > { %s1533_s17 = scalar_lea.vmem %s1532_s15, 512  ;;  %p1534_p4 = scmp.lt.s32.totalorder %s1729_s18, %s1532_s15 }
  0x22   : > { %p1529_p1 = pnand %p1527_p0, %p1515_p3  ;;  %p1535_p12 = scmp.lt.s32.totalorder %s1533_s17, %s1526_s11 }
  0x24   : > { %p1530_p2 = pneg %p1529_p1  ;;  %p1536_p11 = por %p1535_p12, %p1534_p4 }
  0x26   : > { %p1537_p6 = pnand %p1536_p11, %p1530_p2 }
  0x28   : > { %1540 = shalt.err (!%p1537_p6)
}
  0x29   : > { %1300 = dma.hbm_to_vmem [thread:$0]  (!%p1725_p13), %s1721_s16, 256, %s1729_s18, %s213_s20  }
  0x2a   : > { %p2200_p9 = scmp.lt.s32.totalorder %s1605_s24, 3  ;;  %p2201_p7 = scmp.ge.s32.totalorder %s1605_s24, 1 }
  0x2c   : > { %p230_p0 = pnand %p2201_p7, %p2200_p9 }
  0x2d   : > { %s1756_s26 = sand.u32 (!%p230_p0), 1, %s1597_s22   ;;  %p2202_p6 = scmp.ne.s32.totalorder (!%p230_p0), %s2196_s8, 0 }
  0x2e   : > { %233 = sbr.rel (%p230_p0) target bundleno = 1179 (0x49b), region = 44  ;;  %s2182_s28 = sshll.u32 (!%p230_p0), %s1756_s26, 4 }
  0x2f   : > { %s236_s29 = scalar_lea.sflag (!%p230_p0), [#allocation5], %s1756_s26  ;;  %s239_s19 = scalar_lea.vmem (!%p230_p0), [#allocation4], %s2182_s28 }
  0x33   : > { %1584 = dma.done.wait (%p2202_p6), %s236_s29, 256  }
  0x34   : > { %1586 = vsyncadd (%p2202_p6), %s236_s29, 4294967040  ;;  %v284_v0 = vlaneseq  ;;  %v1278_v4 = vld [vmem:[%s2178_s5 + $0x1] ss:$2 sm:$0x3]  ;;  %s1608_s8 = smov 17   ;;  %s1609_s12 = smov 15  }
  0x35   : > { %v282_v5 = vld [vmem:[%s2178_s5] ss:$2 sm:$0x3]  ;;  %s1610_s13 = smov 1   ;;  %s1611_s11 = smov 113   ;;  %v1796_v11 = vld [vmem:[%s239_s19 + $0x8] sm:$0xff] }
  0x36   : > { %v285_v1 = vshrl.u32 %v284_v0, 7  ;;  %v1794_v10 = vld [vmem:[%s239_s19] sm:$0xff]  ;;  %s1612_s14 = smov 127   ;;  %s2193_s15 = smov 95   ;;  %v1614_v13 = vmov 0.0   ;;  %vm370_vm0 = vcmask 138240  }
  0x37   : > { %v1804_v12 = vpack.i.bf16 %v1796_v11, %v1794_v10  ;;  %s1615_s17 = smov 111   ;;  %vm358_vm1 = vcmask 121856   ;;  %s2183_s29 = smov 94   ;;  %vm346_vm2 = vcmask 7168   ;;  %vm331_vm3 = vcmask 1039360  }
  0x38   : > { %v1766_v2 = vsub.s32 0, %v285_v1  ;;  %v1768_v3 = vsub.s32 1, %v285_v1  ;;  %s2189_s19 = smov 96   ;;  %s2191_s16 = smov 110   ;;  %vm319_vm4 = vcmask 924672   ;;  %vm484_vm5 = vcmask 769024  }
  0x39   : > { %s2185_s18 = smov 126   ;;  %s2187_s20 = smov 112   ;;  %vm454_vm6 = vcmask 785408   ;;  %vm439_vm7 = vcmask 900096   ;;  %vm469_vm8 = vcmask 777216   ;;  %vm401_vm9 = vcmask 1031168  }
  0x3a   : > { %v310_v6 = vrot.slane %v1278_v4, %v1766_v2  ;;  %v1778_v7 = vrot.slane %v282_v5, %v1766_v2  ;;  %v314_v8 = vrot.slane %v1278_v4, %v1768_v3  ;;  %v1785_v9 = vrot.slane %v282_v5, %v1768_v3  ;;  %s2209_s7 = sshll.u32 %s1756_s26, 4  ;;  %p2210_p12 = scmp.ne.s32.totalorder %s2197_s9, 0 }
  0x3b   : > { %vm416_vm10 = vcmask 916480   ;;  %vm296_vm11 = vcmask 908288   ;;  %vm592_vm12 = vcmask 1043456   ;;  %vm588_vm13 = vcmask 588800   ;;  %s267_s28 = scalar_lea.vmem [#allocation7], %s2209_s7 }
  0x3c   : > { %366 = vrot.lane.b32.xlu0 %v310_v6, %s1608_s8  ;;  %354 = vrot.lane.b32.xlu1 %v1778_v7, %s1609_s12  ;;  %vm1135_vm14 = vcmask 130048  }
  0x40   : > { %368 = vrot.lane.b32.xlu0 %v314_v8, %s1608_s8  ;;  %356 = vrot.lane.b32.xlu1 %v1785_v9, %s1609_s12 }
  0x44   : > { %342 = vrot.lane.b32.xlu0 %v310_v6, %s1610_s13  ;;  %344 = vrot.lane.b32.xlu1 %v314_v8, %s1610_s13 }
  0x48   : > { %315 = vrot.lane.b32.xlu0 %v310_v6, %s1611_s11  ;;  %317 = vrot.lane.b32.xlu1 %v314_v8, %s1611_s11 }
  0x4c   : > { %327 = vrot.lane.b32.xlu0 %v1778_v7, %s1612_s14  ;;  %329 = vrot.lane.b32.xlu1 %v1785_v9, %s1612_s14 }
  0x50   : > { %1354 = vrot.lane.b32.xlu0 %v1804_v12, %s2193_s15  ;;  %467 = vrot.lane.b32.xlu1 %v1614_v13, %s2193_s15  ;;  %s2205_s15 = smov 96  }
  0x54   : > { %1359 = vrot.lane.b32.xlu0 %v1804_v12, %s1615_s17 }
  0xae   : > { %v367_v14 = vpop.permute.xlu0 %366  ;;  %v355_v15 = vpop.permute.xlu1 %354 }
  0xaf   : > { %v375_v26 = vmul.f32 %v367_v14, %v1794_v10  ;;  %v363_v33 = vmul.f32 %v355_v15, %v1794_v10 }
  0xb2   : > { %v369_v16 = vpop.permute.xlu0 %368  ;;  %v357_v17 = vpop.permute.xlu1 %356 }
  0xb3   : > { %v377_v18 = vmul.f32 0.0, %v369_v16  ;;  %v371_v19 = vsel %vm370_vm0, %v367_v14, %v369_v16  ;;  %v365_v20 = vmul.f32 0.0, %v357_v17  ;;  %v359_v25 = vsel %vm358_vm1, %v355_v15, %v357_v17 }
  0xb4   : > { %v376_v23 = vmul.f32 %v371_v19, %v1796_v11  ;;  %v364_v29 = vmul.f32 %v359_v25, %v1796_v11 }
  0xb5   : > { %482 = vrot.lane.b32.xlu1 %v377_v18, %s2183_s29 }
  0xb6   : > { %v343_v21 = vpop.permute.xlu0 %342  ;;  %v345_v22 = vpop.permute.xlu1 %344  ;;  %v1363_v31 = vpack.i.bf16 %v376_v23, %v375_v26  ;;  %v1368_v38 = vpack.i.bf16 %v364_v29, %v363_v33 }
  0xb7   : > { %v353_v24 = vmul.f32 0.0, %v345_v22  ;;  %v347_v32 = vsel %vm346_vm2, %v343_v21, %v345_v22  ;;  %v351_v36 = vmul.f32 %v343_v21, %v1794_v10 }
  0xb8   : > { %v352_v37 = vmul.f32 %v347_v32, %v1796_v11 }
  0xb9   : > { %452 = vrot.lane.b32.xlu1 %v365_v20, %s2189_s19  ;;  %437 = vrot.lane.b32.xlu0 %v353_v24, %s2191_s16 }
  0xba   : > { %v316_v27 = vpop.permute.xlu0 %315  ;;  %v318_v28 = vpop.permute.xlu1 %317  ;;  %v1373_v46 = vpack.i.bf16 %v352_v37, %v351_v36 }
  0xbb   : > { %v324_v30 = vmul.f32 0.0, %v316_v27  ;;  %v320_v40 = vsel %vm319_vm4, %v316_v27, %v318_v28  ;;  %v326_v45 = vmul.f32 %v318_v28, %v1796_v11 }
  0xbc   : > { %v325_v44 = vmul.f32 %v320_v40, %v1794_v10 }
  0xbd   : > { %395 = vrot.lane.b32.xlu1 %v324_v30, %s2185_s18  ;;  %1364 = vrot.lane.b32.xlu0 %v1363_v31, %s2183_s29  ;;  %s2206_s29 = smov 112  }
  0xbe   : > { %v328_v34 = vpop.permute.xlu0 %327  ;;  %v330_v35 = vpop.permute.xlu1 %329  ;;  %v1378_v48 = vpack.i.bf16 %v326_v45, %v325_v44 }
  0xbf   : > { %v332_v39 = vsel %vm331_vm3, %v328_v34, %v330_v35  ;;  %v336_v41 = vmul.f32 0.0, %v328_v34  ;;  %v338_v43 = vmul.f32 %v330_v35, %v1796_v11 }
  0xc0   : > { %v337_v42 = vmul.f32 %v332_v39, %v1794_v10 }
  0xc1   : > { %292 = vrot.lane.b32.xlu1 %v1778_v7, %s1615_s17  ;;  %1369 = vrot.lane.b32.xlu0 %v1368_v38, %s2189_s19  ;;  %s2207_s19 = smov 126  }
  0xc2   : > { %v1383_v47 = vpack.i.bf16 %v338_v43, %v337_v42  ;;  %v1355_v49 = vpop.permute.xlu0 %1354  ;;  %v468_v50 = vpop.permute.xlu1 %467 }
  0xc3   : > { %v1356_v62 = vunpack.i.l.bf16 %v1355_v49  ;;  %v1357_v15 = vunpack.i.h.bf16 %v1355_v49 }
  0xc5   : > { %410 = vrot.lane.b32.xlu0 %v336_v41, %s2187_s20  ;;  %1374 = vrot.lane.b32.xlu1 %v1373_v46, %s2191_s16  ;;  %v470_v20 = vsel %vm469_vm8, %v1356_v62, %v1357_v15  ;;  %v471_v30 = vsel %vm469_vm8, %v1357_v15, %v468_v50  ;;  %s2208_s16 = smov 94  }
  0xc6   : > { %v1845_v51 = vpop.permute.xlu0 %1359 }
  0xc7   : > { %v1361_v7 = vunpack.i.l.bf16 %v1845_v51  ;;  %v1362_v29 = vunpack.i.h.bf16 %v1845_v51 }
  0xc9   : > { %1384 = vrot.lane.b32.xlu0 %v1383_v47, %s2187_s20  ;;  %1379 = vrot.lane.b32.xlu1 %v1378_v48, %s2185_s18  ;;  %v426_v38 = vsel %vm296_vm11, %v1361_v7, %v1362_v29  ;;  %v1621_v47 = vmov 0  }
  0xca   : > { %631 = vmatprep.mubr.bf16.mxu0 %v1621_v47  ;;  %1394 = vset.pattern.permute.xlu1 %v1621_v47 }
  0xcb   : > { %1393 = vset.pattern.permute.xlu0 %v1621_v47 }
  0xcd   : > { %294 = vrot.lane.b32.xlu0 %v1785_v9, %s1615_s17  ;;  %1389 = vrot.lane.b32.xlu1 %v1804_v12, %s1612_s14 }
  0xd1   : > { %381 = vrot.lane.b32.xlu0 %v1614_v13, %s1612_s14 }
 0x127   : > { %v483_v52 = vpop.permute.xlu1 %482 }
 0x12b   : > { %v453_v53 = vpop.permute.xlu1 %452  ;;  %v438_v54 = vpop.permute.xlu0 %437 }
 0x12f   : > { %v396_v55 = vpop.permute.xlu1 %395  ;;  %v1365_v56 = vpop.permute.xlu0 %1364 }
 0x130   : > { %v1366_v57 = vunpack.i.l.bf16 %v1365_v56  ;;  %v1367_v59 = vunpack.i.h.bf16 %v1365_v56  ;;  %v656_v56 = vld [vmem:[%s2178_s5] ss:$2 sm:$0x3] }
 0x132   : > { %v504_v58 = vpack.c.bf16 %v1366_v57, %v1366_v57  ;;  %v485_v6 = vsel %vm484_vm5, %v1366_v57, %v1367_v59  ;;  %v486_v17 = vsel %vm484_vm5, %v1367_v59, %v483_v52  ;;  %v508_v59 = vld [vmem:[%s2175_s2 + $0x8] sm:$0xff] }
 0x133   : > { %v1847_v60 = vpop.permute.xlu1 %292  ;;  %v1370_v61 = vpop.permute.xlu0 %1369  ;;  %v505_v14 = vpack.c.bf16 %v485_v6, %v485_v6  ;;  %v506_v22 = vpack.c.bf16 %v486_v17, %v486_v17 }
 0x134   : > { %v1371_v63 = vunpack.i.l.bf16 %v1370_v61  ;;  %563 = vrot.lane.b32.xlu1 %v504_v58, %s1608_s8  ;;  %v1372_v1 = vunpack.i.h.bf16 %v1370_v61  ;;  %v1893_v58 = vrot.slane %v656_v56, %v1768_v3  ;;  %v1902_v61 = vrot.slane %v656_v56, %v1766_v2 }
 0x136   : > { %v501_v0 = vpack.c.bf16 %v1356_v62, %v1371_v63  ;;  %v455_v16 = vsel %vm454_vm6, %v1371_v63, %v1372_v1  ;;  %v456_v24 = vsel %vm454_vm6, %v1372_v1, %v453_v53 }
 0x137   : > { %v411_v4 = vpop.permute.xlu0 %410  ;;  %v1375_v5 = vpop.permute.xlu1 %1374  ;;  %v502_v21 = vpack.c.bf16 %v470_v20, %v455_v16  ;;  %v503_v32 = vpack.c.bf16 %v471_v30, %v456_v24 }
 0x138   : > { %v1376_v8 = vunpack.i.l.bf16 %v1375_v5  ;;  %557 = vrot.lane.b32.xlu0 %v501_v0, %s1608_s8  ;;  %v1377_v9 = vunpack.i.h.bf16 %v1375_v5 }
 0x13a   : > { %v498_v12 = vpack.c.bf16 %v1376_v8, %v1361_v7  ;;  %v441_v23 = vsel %vm439_vm7, %v1377_v9, %v438_v54  ;;  %v440_v33 = vsel %vm439_vm7, %v1376_v8, %v1377_v9 }
 0x13b   : > { %v1385_v18 = vpop.permute.xlu0 %1384  ;;  %v1380_v19 = vpop.permute.xlu1 %1379  ;;  %v500_v31 = vpack.c.bf16 %v441_v23, %v1362_v29  ;;  %v499_v39 = vpack.c.bf16 %v440_v33, %v426_v38  ;;  %v1510_v29 = vld [vmem:[%s2174_s1] sm:$0xff]  }
 0x13c   : > { %565 = vrot.lane.b32.xlu0 %v505_v14, %s1608_s8  ;;  %551 = vrot.lane.b32.xlu1 %v498_v12, %s1608_s8  ;;  %v1387_v25 = vunpack.i.h.bf16 %v1385_v18  ;;  %v1386_v26 = vunpack.i.l.bf16 %v1385_v18  ;;  %v1382_v27 = vunpack.i.h.bf16 %v1380_v19  ;;  %v1381_v28 = vunpack.i.l.bf16 %v1380_v19 }
 0x13e   : > { %v403_v34 = vsel %vm401_vm9, %v1381_v28, %v1382_v27  ;;  %v418_v35 = vsel %vm416_vm10, %v1386_v26, %v1387_v25  ;;  %v402_v41 = vsel %vm401_vm9, %v396_v55, %v1381_v28  ;;  %v417_v45 = vsel %vm416_vm10, %v411_v4, %v1386_v26 }
 0x13f   : > { %v295_v36 = vpop.permute.xlu0 %294  ;;  %v1390_v37 = vpop.permute.xlu1 %1389  ;;  %v496_v40 = vpack.c.bf16 %v418_v35, %v403_v34  ;;  %v497_v48 = vpack.c.bf16 %v1387_v25, %v1382_v27  ;;  %v495_v50 = vpack.c.bf16 %v417_v45, %v402_v41  ;;  %v301_v55 = vmul.f32 0.0, %v1847_v60 }
 0x140   : > { %559 = vrot.lane.b32.xlu0 %v502_v21, %s1608_s8  ;;  %567 = vrot.lane.b32.xlu1 %v506_v22, %s1608_s8  ;;  %v297_v42 = vsel %vm296_vm11, %v1847_v60, %v295_v36  ;;  %v1392_v43 = vunpack.i.h.bf16 %v1390_v37  ;;  %v1391_v44 = vunpack.i.l.bf16 %v1390_v37  ;;  %v303_v46 = vmul.f32 %v295_v36, %v1796_v11  ;;  %v1282_v60 = vld [vmem:[%s2178_s5 + $0x1] ss:$2 sm:$0x3] }
 0x141   : > { %v302_v49 = vmul.f32 %v297_v42, %v1794_v10  ;;  %v507_v10 = vld [vmem:[%s2175_s2] sm:$0xff]  ;;  %v689_v62 = vrot.slane %v1282_v60, %v1768_v3  ;;  %v685_v63 = vrot.slane %v1282_v60, %v1766_v2 }
 0x142   : > { %v388_v51 = vsel %vm331_vm3, %v1391_v44, %v1392_v43  ;;  %v494_v52 = vpack.c.bf16 %v1392_v43, %v303_v46 }
 0x143   : > { %v382_v53 = vpop.permute.xlu0 %381  ;;  %v493_v11 = vpack.c.bf16 %v388_v51, %v302_v49 }
 0x144   : > { %555 = vrot.lane.b32.xlu0 %v500_v31, %s1608_s8  ;;  %561 = vrot.lane.b32.xlu1 %v503_v32, %s1608_s8  ;;  %v387_v54 = vsel %vm331_vm3, %v382_v53, %v1391_v44 }
 0x145   : > { %v492_v57 = vpack.c.bf16 %v387_v54, %v301_v55 }
 0x148   : > { %553 = vrot.lane.b32.xlu1 %v499_v39, %s1608_s8  ;;  %547 = vrot.lane.b32.xlu0 %v496_v40, %s1608_s8 }
 0x14c   : > { %549 = vrot.lane.b32.xlu1 %v497_v48, %s1608_s8  ;;  %545 = vrot.lane.b32.xlu0 %v495_v50, %s1608_s8 }
 0x150   : > { %541 = vrot.lane.b32.xlu1 %v493_v11, %s1608_s8  ;;  %543 = vrot.lane.b32.xlu0 %v494_v52, %s1608_s8 }
 0x154   : > { %539 = vrot.lane.b32.xlu1 %v492_v57, %s1608_s8  ;;  %511 = vperm.xlu0 %1393, %v507_v10  }
 0x158   : > { %516 = vperm.xlu1 %1394, %v508_v59   ;;  %740 = vrot.lane.b32.xlu0 %v1893_v58, %s1609_s12 }
 0x15c   : > { %738 = vrot.lane.b32.xlu1 %v1902_v61, %s1609_s12  ;;  %726 = vrot.lane.b32.xlu0 %v689_v62, %s1610_s13  ;;  %s1199_s12 = sshll.u32 %s267_s28, 4  ;;  %s1200_s12 = int_to_ptr.vmem [resolvable:$true] %s1199_s12 }
 0x160   : > { %724 = vrot.lane.b32.xlu1 %v685_v63, %s1610_s13  ;;  %706 = vrot.lane.b32.xlu0 %v1893_v58, %s1612_s14  ;;  %s2203_s13 = smov 95  }
 0x164   : > { %704 = vrot.lane.b32.xlu1 %v1902_v61, %s1612_s14  ;;  %692 = vrot.lane.b32.xlu0 %v689_v62, %s1611_s11 }
 0x168   : > { %690 = vrot.lane.b32.xlu1 %v685_v63, %s1611_s11  ;;  %754 = vrot.lane.b32.xlu0 %v689_v62, %s1608_s8  ;;  %s2204_s11 = smov 110  }
 0x16c   : > { %752 = vrot.lane.b32.xlu1 %v685_v63, %s1608_s8 }
 0x1a6   : > { %v564_v3 = vpop.permute.xlu1 %563 }
 0x1aa   : > { %v558_v2 = vpop.permute.xlu0 %557 }
 0x1ae   : > { %v566_v0 = vpop.permute.xlu0 %565  ;;  %v552_v1 = vpop.permute.xlu1 %551 }
 0x1af   : > { %v578_v4 = vsel %vm370_vm0, %v564_v3, %v566_v0 }
 0x1b0   : > { %v594_v8 = vsel %vm592_vm12, %v578_v4, 0 }
 0x1b2   : > { %v560_v5 = vpop.permute.xlu0 %559  ;;  %v568_v6 = vpop.permute.xlu1 %567 }
 0x1b3   : > { %v579_v7 = vsel %vm370_vm0, %v566_v0, %v568_v6  ;;  %v576_v15 = vsel %vm370_vm0, %v558_v2, %v560_v5 }
 0x1b4   : > { %1280 = vmatprep.subr.msk.bf16.mxu0 %vm592_vm12, %v579_v7 }
 0x1b5   : > { %606 = vmatpush1.bf16.msra.mxu0 %v594_v8 }
 0x1b6   : > { %v556_v9 = vpop.permute.xlu0 %555  ;;  %v562_v12 = vpop.permute.xlu1 %561 }
 0x1b7   : > { %v577_v14 = vsel %vm370_vm0, %v560_v5, %v562_v12 }
 0x1b8   : > { %607 = vmatprep.subr.bf16.mxu0 %v577_v14 }
 0x1b9   : > { %608 = vmatpush1.bf16.msra.mxu0 %v576_v15 }
 0x1ba   : > { %v554_v16 = vpop.permute.xlu1 %553  ;;  %v548_v17 = vpop.permute.xlu0 %547 }
 0x1bb   : > { %v575_v18 = vsel %vm370_vm0, %v554_v16, %v556_v9  ;;  %v574_v19 = vsel %vm370_vm0, %v552_v1, %v554_v16 }
 0x1bc   : > { %609 = vmatprep.subr.bf16.mxu0 %v575_v18 }
 0x1bd   : > { %610 = vmatpush1.bf16.msra.mxu0 %v574_v19 }
 0x1be   : > { %v550_v20 = vpop.permute.xlu1 %549  ;;  %v546_v21 = vpop.permute.xlu0 %545 }
 0x1bf   : > { %v573_v22 = vsel %vm370_vm0, %v548_v17, %v550_v20  ;;  %v572_v23 = vsel %vm370_vm0, %v546_v21, %v548_v17 }
 0x1c0   : > { %611 = vmatprep.subr.bf16.mxu0 %v573_v22 }
 0x1c1   : > { %612 = vmatpush1.bf16.msra.mxu0 %v572_v23 }
 0x1c2   : > { %v542_v24 = vpop.permute.xlu1 %541  ;;  %v544_v25 = vpop.permute.xlu0 %543 }
 0x1c3   : > { %v571_v26 = vsel %vm370_vm0, %v542_v24, %v544_v25 }
 0x1c4   : > { %613 = vmatprep.subr.bf16.mxu0 %v571_v26 }
 0x1c6   : > { %v540_v27 = vpop.permute.xlu1 %539 }
 0x1c7   : > { %v570_v28 = vsel %vm370_vm0, %v540_v27, %v542_v24 }
 0x1c8   : > { %614 = vmatpush1.bf16.msra.mxu0 %v570_v28 }
 0x1cb   : > { %1281 = vmatmul.mubr.msk.bf16.vlgmr.msra.gmra.mxu0 %vm588_vm13, %v1510_v29 }
 0x1cf   : > { %v512_v30 = vpop.permute.xlu0 %511 }
 0x1d3   : > { %v517_v31 = vpop.permute.xlu1 %516  ;;  %v741_v32 = vpop.permute.xlu0 %740 }
 0x1d4   : > { %v748_v3 = vmul.f32 0.0, %v741_v32 }
 0x1d7   : > { %v739_v33 = vpop.permute.xlu1 %738  ;;  %v727_v37 = vpop.permute.xlu0 %726 }
 0x1d8   : > { %v742_v50 = vsel %vm358_vm1, %v739_v33, %v741_v32  ;;  %v734_v10 = vmul.f32 0.0, %v727_v37 }
 0x1db   : > { %v725_v39 = vpop.permute.xlu1 %724  ;;  %v707_v60 = vpop.permute.xlu0 %706 }
 0x1dc   : > { %v728_v41 = vsel %vm346_vm2, %v725_v39, %v727_v37 }
 0x1df   : > { %v705_v59 = vpop.permute.xlu1 %704  ;;  %v693_v6 = vpop.permute.xlu0 %692 }
 0x1e0   : > { %v708_v4 = vsel %vm331_vm3, %v705_v59, %v707_v60  ;;  %v712_v17 = vmul.f32 0.0, %v705_v59 }
 0x1e2   : > { %v1450_v21 = vpack.i.bf16 %v712_v17, %v712_v17 }
 0x1e3   : > { %v691_v5 = vpop.permute.xlu1 %690  ;;  %v755_v32 = vpop.permute.xlu0 %754 }
 0x1e4   : > { %v694_v7 = vsel %vm319_vm4, %v691_v5, %v693_v6  ;;  %v698_v22 = vmul.f32 0.0, %v691_v5 }
 0x1e6   : > { %v1465_v25 = vpack.i.bf16 %v698_v22, %v698_v22 }
 0x28b   : > { %v633_v34 = vpop.f32.mrf.mxu0 }
 0x28c   : > { %v634_v35 = vadd.f32 %v633_v34, %v512_v30 }
 0x28d   : > { %v635_v36 = vpop.f32.mrf.mxu0 }
 0x28e   : > { %v636_v38 = vadd.f32 %v635_v36, %v512_v30  ;;  %v1934_v42 = vmax.f32 %v634_v35, 0.0  ;;  %v762_v35 = vmul.f32 0.0, %v755_v32 }
 0x28f   : > { %v637_v40 = vpop.f32.mrf.mxu0 }
 0x290   : > { %v1936_v43 = vmax.f32 %v636_v38, 0.0  ;;  %v638_v44 = vadd.f32 %v637_v40, %v517_v31  ;;  %v732_v51 = vmul.f32 %v725_v39, %v1934_v42  ;;  %v746_v55 = vmul.f32 %v739_v33, %v1934_v42 }
 0x291   : > { %v639_v45 = vpop.f32.mrf.mxu0  ;;  %v713_v15 = vmul.f32 %v708_v4, %v1934_v42  ;;  %v699_v16 = vmul.f32 %v694_v7, %v1934_v42 }
 0x292   : > { %v1938_v46 = vmax.f32 %v638_v44, 0.0  ;;  %v1400_v47 = vpack.i.bf16 %v1936_v43, %v1934_v42  ;;  %v640_v48 = vadd.f32 %v639_v45, %v517_v31  ;;  %v733_v49 = vmul.f32 %v728_v41, %v1936_v43  ;;  %v753_v31 = vpop.permute.xlu1 %752 }
 0x293   : > { %v747_v53 = vmul.f32 %v742_v50, %v1936_v43  ;;  %v714_v9 = vmul.f32 %v707_v60, %v1936_v43  ;;  %v700_v14 = vmul.f32 %v693_v6, %v1936_v43  ;;  %v760_v37 = vmul.f32 %v753_v31, %v1934_v42 }
 0x294   : > { %1401 = vrot.lane.b32.xlu0 %v1400_v47, %s1615_s17  ;;  %1396 = vrot.lane.b32.xlu1 %v1400_v47, %s2203_s13  ;;  %v1405_v52 = vpack.i.bf16 %v1938_v46, %v1614_v13  ;;  %v1950_v11 = vmax.f32 %v640_v48, 0.0  ;;  %v1415_v54 = vpack.i.bf16 %v733_v49, %v732_v51  ;;  %v735_v57 = vmul.f32 %v725_v39, %v1938_v46 }
 0x295   : > { %v1410_v56 = vpack.i.bf16 %v747_v53, %v746_v55  ;;  %v749_v63 = vmul.f32 %v739_v33, %v1938_v46  ;;  %v1445_v18 = vpack.i.bf16 %v714_v9, %v713_v15  ;;  %v1455_v19 = vpack.i.bf16 %v700_v14, %v699_v16 }
 0x296   : > { %v1420_v62 = vpack.i.bf16 %v1614_v13, %v1950_v11  ;;  %v1430_v2 = vpack.i.bf16 %v735_v57, %v734_v10  ;;  %v750_v0 = vmul.f32 %v742_v50, %v1950_v11  ;;  %v1435_v12 = vpack.i.bf16 %v1950_v11, %v1938_v46 }
 0x297   : > { %v1425_v1 = vpack.i.bf16 %v749_v63, %v748_v3  ;;  %v736_v20 = vmul.f32 %v728_v41, %v1950_v11  ;;  %v703_v24 = vmul.f32 %v693_v6, %v1950_v11  ;;  %v717_v26 = vmul.f32 %v707_v60, %v1950_v11 }
 0x298   : > { %1406 = vrot.lane.b32.xlu0 %v1405_v52, %s2203_s13  ;;  %1416 = vrot.lane.b32.xlu1 %v1415_v54, %s2204_s11  ;;  %v1440_v8 = vpack.i.bf16 %v748_v3, %v750_v0  ;;  %v702_v27 = vmul.f32 %v694_v7, %v1938_v46  ;;  %v716_v28 = vmul.f32 %v708_v4, %v1938_v46 }
 0x299   : > { %v1460_v23 = vpack.i.bf16 %v734_v10, %v736_v20  ;;  %v756_v33 = vsel %vm370_vm0, %v753_v31, %v755_v32  ;;  %v763_v34 = vmul.f32 %v753_v31, %v1938_v46 }
 0x29a   : > { %v1485_v29 = vpack.i.bf16 %v703_v24, %v702_v27  ;;  %v1475_v30 = vpack.i.bf16 %v717_v26, %v716_v28  ;;  %v761_v36 = vmul.f32 %v756_v33, %v1936_v43  ;;  %v764_v40 = vmul.f32 %v756_v33, %v1950_v11 }
 0x29b   : > { %v1500_v38 = vpack.i.bf16 %v763_v34, %v762_v35 }
 0x29c   : > { %1411 = vrot.lane.b32.xlu0 %v1410_v56, %s2205_s15  ;;  %1421 = vrot.lane.b32.xlu1 %v1420_v62, %s2203_s13  ;;  %v1495_v39 = vpack.i.bf16 %v761_v36, %v760_v37 }
 0x2a0   : > { %1431 = vrot.lane.b32.xlu0 %v1430_v2, %s2204_s11  ;;  %1426 = vrot.lane.b32.xlu1 %v1425_v1, %s2205_s15 }
 0x2a4   : > { %1441 = vrot.lane.b32.xlu0 %v1440_v8, %s2205_s15  ;;  %1436 = vrot.lane.b32.xlu1 %v1435_v12, %s1615_s17 }
 0x2a8   : > { %1446 = vrot.lane.b32.xlu0 %v1445_v18, %s2206_s29  ;;  %1456 = vrot.lane.b32.xlu1 %v1455_v19, %s2207_s19 }
 0x2ac   : > { %1451 = vrot.lane.b32.xlu0 %v1450_v21, %s2206_s29  ;;  %1461 = vrot.lane.b32.xlu1 %v1460_v23, %s2204_s11 }
 0x2b0   : > { %1471 = vrot.lane.b32.xlu0 %v1400_v47, %s1612_s14  ;;  %1466 = vrot.lane.b32.xlu1 %v1465_v25, %s2207_s19 }
 0x2b4   : > { %1486 = vrot.lane.b32.xlu0 %v1485_v29, %s2207_s19  ;;  %1476 = vrot.lane.b32.xlu1 %v1475_v30, %s2206_s29  ;;  %s1185_s29 = scalar_lea.sflag [#allocation6], %s1756_s26  ;;  %s1541_s19 = scalar_lea.vmem %s1200_s12, 256 }
 0x2b5   : > { %p1542_p11 = scmp.ne.s32.totalorder %s1200_s12, %s1541_s19 }
 0x2b7   : > { %p1543_p13 = pnand %p1542_p11, %p2210_p12 }
 0x2b8   : > { %1491 = vrot.lane.b32.xlu0 %v1614_v13, %s1612_s14  ;;  %1481 = vrot.lane.b32.xlu1 %v1435_v12, %s1612_s14  ;;  %v1505_v13 = vpack.i.bf16 %v762_v35, %v764_v40 }
 0x2b9   : > { %p1544_p1 = pneg %p1543_p13 }
 0x2bc   : > { %668 = vrot.lane.b32.xlu0 %v1893_v58, %s1615_s17  ;;  %666 = vrot.lane.b32.xlu1 %v1902_v61, %s1615_s17 }
 0x2c0   : > { %1501 = vrot.lane.b32.xlu0 %v1500_v38, %s2208_s16  ;;  %1496 = vrot.lane.b32.xlu1 %v1495_v39, %s2208_s16 }
 0x2c4   : > { %1506 = vrot.lane.b32.xlu1 %v1505_v13, %s2208_s16 }
 0x306   : > { %v1402_v41 = vpop.permute.xlu0 %1401  ;;  %v1397_v44 = vpop.permute.xlu1 %1396 }
 0x307   : > { %v1398_v58 = vunpack.i.l.bf16 %v1397_v44  ;;  %v1404_v59 = vunpack.i.h.bf16 %v1402_v41  ;;  %v1403_v60 = vunpack.i.l.bf16 %v1402_v41  ;;  %v1399_v3 = vunpack.i.h.bf16 %v1397_v44 }
 0x309   : > { %v940_v12 = vsel %vm469_vm8, %v1398_v58, %v1399_v3  ;;  %v858_v23 = vsel %vm296_vm11, %v1403_v60, %v1404_v59 }
 0x30a   : > { %v1407_v45 = vpop.permute.xlu0 %1406  ;;  %v2002_v47 = vpop.permute.xlu1 %1416 }
 0x30b   : > { %v1409_v48 = vunpack.i.h.bf16 %v1407_v45  ;;  %v1418_v52 = vunpack.i.l.bf16 %v2002_v47  ;;  %v1408_v9 = vunpack.i.l.bf16 %v1407_v45 }
 0x30d   : > { %v1000_v49 = vpack.c.bf16 %v1409_v48, %v1398_v58  ;;  %v941_v19 = vsel %vm469_vm8, %v1399_v3, %v1408_v9 }
 0x30e   : > { %v2004_v61 = vpop.permute.xlu0 %1411  ;;  %v1422_v50 = vpop.permute.xlu1 %1421 }
 0x30f   : > { %1087 = vrot.lane.b32.xlu0 %v1000_v49, %s1608_s8  ;;  %v1423_v56 = vunpack.i.l.bf16 %v1422_v50  ;;  %v1424_v5 = vunpack.i.h.bf16 %v1422_v50  ;;  %v1413_v8 = vunpack.i.l.bf16 %v2004_v61  ;;  %v1414_v35 = vunpack.i.h.bf16 %v2004_v61 }
 0x310   : > { %v1419_v61 = vunpack.i.h.bf16 %v2002_v47 }
 0x311   : > { %v942_v7 = vsel %vm469_vm8, %v1409_v48, %v1423_v56  ;;  %v943_v17 = vsel %vm469_vm8, %v1423_v56, %v1424_v5  ;;  %v912_v49 = vsel %vm454_vm6, %v1413_v8, %v1414_v35 }
 0x312   : > { %v2007_v51 = vpop.permute.xlu0 %1431  ;;  %v2010_v53 = vpop.permute.xlu1 %1426  ;;  %v1001_v15 = vpack.c.bf16 %v942_v7, %v940_v12  ;;  %v1002_v20 = vpack.c.bf16 %v943_v17, %v941_v19 }
 0x313   : > { %v1434_v54 = vunpack.i.h.bf16 %v2007_v51  ;;  %v1429_v2 = vunpack.i.h.bf16 %v2010_v53  ;;  %v1428_v36 = vunpack.i.l.bf16 %v2010_v53  ;;  %v1433_v48 = vunpack.i.l.bf16 %v2007_v51 }
 0x315   : > { %v994_v55 = vpack.c.bf16 %v1434_v54, %v1418_v52  ;;  %v997_v14 = vpack.c.bf16 %v1429_v2, %v1413_v8 }
 0x316   : > { %v1442_v10 = vpop.permute.xlu0 %1441  ;;  %v1437_v57 = vpop.permute.xlu1 %1436 }
 0x317   : > { %1075 = vrot.lane.b32.xlu0 %v994_v55, %s1608_s8  ;;  %v1439_v62 = vunpack.i.h.bf16 %v1437_v57  ;;  %v1438_v63 = vunpack.i.l.bf16 %v1437_v57  ;;  %v1444_v27 = vunpack.i.h.bf16 %v1442_v10  ;;  %v1443_v28 = vunpack.i.l.bf16 %v1442_v10 }
 0x318   : > { %v913_v55 = vsel %vm454_vm6, %v1414_v35, %v1428_v36 }
 0x319   : > { %v991_v0 = vpack.c.bf16 %v1438_v63, %v1403_v60  ;;  %v993_v1 = vpack.c.bf16 %v1439_v62, %v1404_v59  ;;  %v859_v22 = vsel %vm296_vm11, %v1438_v63, %v1439_v62  ;;  %v914_v44 = vsel %vm454_vm6, %v1429_v2, %v1443_v28 }
 0x31a   : > { %v2019_v4 = vpop.permute.xlu0 %1446  ;;  %v2021_v6 = vpop.permute.xlu1 %1456  ;;  %v992_v26 = vpack.c.bf16 %v859_v22, %v858_v23  ;;  %v915_v58 = vsel %vm454_vm6, %v1443_v28, %v1444_v27  ;;  %v998_v53 = vpack.c.bf16 %v914_v44, %v912_v49  ;;  %v885_v63 = vsel %vm439_vm7, %v1419_v61, %v1433_v48  ;;  %v2094_v44 = vld [vmem:[%s2176_s3] sm:$0xff] }
 0x31b   : > { %1073 = vrot.lane.b32.xlu0 %v993_v1, %s1608_s8  ;;  %1069 = vrot.lane.b32.xlu1 %v991_v0, %s1608_s8  ;;  %v1449_v29 = vunpack.i.h.bf16 %v2019_v4  ;;  %v1448_v31 = vunpack.i.l.bf16 %v2019_v4  ;;  %v999_v56 = vpack.c.bf16 %v915_v58, %v913_v55  ;;  %v884_v0 = vsel %vm439_vm7, %v1418_v52, %v1419_v61 }
 0x31c   : > { %v1458_v1 = vunpack.i.l.bf16 %v2021_v6 }
 0x31e   : > { %v1462_v16 = vpop.permute.xlu1 %1461  ;;  %v1452_v18 = vpop.permute.xlu0 %1451 }
 0x31f   : > { %1089 = vrot.lane.b32.xlu0 %v1001_v15, %s1608_s8  ;;  %1081 = vrot.lane.b32.xlu1 %v997_v14, %s1608_s8  ;;  %v1453_v24 = vunpack.i.l.bf16 %v1452_v18  ;;  %v1454_v32 = vunpack.i.h.bf16 %v1452_v18  ;;  %v1464_v40 = vunpack.i.h.bf16 %v1462_v16  ;;  %v1463_v13 = vunpack.i.l.bf16 %v1462_v16 }
 0x321   : > { %v840_v38 = vsel %vm416_vm10, %v1453_v24, %v1448_v31  ;;  %v887_v57 = vsel %vm439_vm7, %v1463_v13, %v1464_v40  ;;  %v886_v59 = vsel %vm439_vm7, %v1434_v54, %v1463_v13  ;;  %v1459_v54 = vunpack.i.h.bf16 %v2021_v6 }
 0x322   : > { %v1467_v21 = vpop.permute.xlu1 %1466  ;;  %v2035_v25 = vpop.permute.xlu0 %1471  ;;  %v996_v2 = vpack.c.bf16 %v887_v57, %v885_v63  ;;  %v995_v5 = vpack.c.bf16 %v886_v59, %v884_v0 }
 0x323   : > { %1091 = vrot.lane.b32.xlu1 %v1002_v20, %s1608_s8  ;;  %v1469_v60 = vunpack.i.h.bf16 %v1467_v21  ;;  %v1468_v62 = vunpack.i.l.bf16 %v1467_v21  ;;  %v1474_v52 = vunpack.i.h.bf16 %v2035_v25  ;;  %v1473_v17 = vunpack.i.l.bf16 %v2035_v25 }
 0x324   : > { %v841_v20 = vsel %vm416_vm10, %v1448_v31, %v1449_v29  ;;  %v813_v27 = vsel %vm401_vm9, %v1458_v1, %v1459_v54 }
 0x325   : > { %v812_v8 = vsel %vm401_vm9, %v1468_v62, %v1458_v1 }
 0x326   : > { %v1477_v30 = vpop.permute.xlu1 %1476  ;;  %v1487_v45 = vpop.permute.xlu0 %1486 }
 0x327   : > { %v1479_v33 = vunpack.i.h.bf16 %v1477_v30  ;;  %v1478_v34 = vunpack.i.l.bf16 %v1477_v30  ;;  %1071 = vrot.lane.b32.xlu1 %v992_v26, %s1608_s8  ;;  %v1488_v10 = vunpack.i.l.bf16 %v1487_v45  ;;  %v1489_v4 = vunpack.i.h.bf16 %v1487_v45 }
 0x329   : > { %v990_v37 = vpack.c.bf16 %v1479_v33, %v1449_v29  ;;  %v842_v39 = vsel %vm416_vm10, %v1454_v32, %v1478_v34  ;;  %v814_v51 = vsel %vm401_vm9, %v1469_v60, %v1488_v10  ;;  %v987_v47 = vpack.c.bf16 %v1489_v4, %v1459_v54 }
 0x32a   : > { %v988_v41 = vpack.c.bf16 %v842_v39, %v840_v38  ;;  %v1482_v50 = vpop.permute.xlu1 %1481  ;;  %v1492_v3 = vpop.permute.xlu0 %1491  ;;  %v985_v12 = vpack.c.bf16 %v814_v51, %v812_v8  ;;  %v843_v16 = vsel %vm416_vm10, %v1478_v34, %v1479_v33  ;;  %v815_v6 = vsel %vm401_vm9, %v1488_v10, %v1489_v4 }
 0x32b   : > { %1067 = vrot.lane.b32.xlu1 %v990_v37, %s1608_s8  ;;  %v1484_v9 = vunpack.i.h.bf16 %v1482_v50  ;;  %v1483_v14 = vunpack.i.l.bf16 %v1482_v50  ;;  %v1494_v21 = vunpack.i.h.bf16 %v1492_v3  ;;  %v1493_v22 = vunpack.i.l.bf16 %v1492_v3 }
 0x32c   : > { %1063 = vrot.lane.b32.xlu0 %v988_v41, %s1608_s8  ;;  %v989_v24 = vpack.c.bf16 %v843_v16, %v841_v20  ;;  %v986_v25 = vpack.c.bf16 %v815_v6, %v813_v27  ;;  %v785_v29 = vsel %vm331_vm3, %v1473_v17, %v1474_v52 }
 0x32d   : > { %v984_v18 = vpack.c.bf16 %v1484_v9, %v1474_v52  ;;  %v787_v26 = vsel %vm331_vm3, %v1483_v14, %v1484_v9  ;;  %v786_v31 = vsel %vm331_vm3, %v1494_v21, %v1483_v14  ;;  %v784_v32 = vsel %vm331_vm3, %v1493_v22, %v1473_v17 }
 0x32e   : > { %v667_v7 = vpop.permute.xlu1 %666  ;;  %v669_v15 = vpop.permute.xlu0 %668  ;;  %v983_v33 = vpack.c.bf16 %v787_v26, %v785_v29  ;;  %v982_v35 = vpack.c.bf16 %v786_v31, %v784_v32 }
 0x32f   : > { %1083 = vrot.lane.b32.xlu1 %v998_v53, %s1608_s8  ;;  %v670_v23 = vsel %vm296_vm11, %v667_v7, %v669_v15  ;;  %v674_v36 = vmul.f32 0.0, %v667_v7 }
 0x330   : > { %1085 = vrot.lane.b32.xlu0 %v999_v56, %s1608_s8  ;;  %v675_v28 = vmul.f32 %v670_v23, %v1934_v42  ;;  %v678_v30 = vmul.f32 %v670_v23, %v1938_v46  ;;  %v676_v42 = vmul.f32 %v669_v15, %v1936_v43  ;;  %v679_v46 = vmul.f32 %v669_v15, %v1950_v11  ;;  %v1006_v56 = vld [vmem:[%s2177_s4] sm:$0xff] }
 0x331   : > { %v979_v45 = vpack.c.bf16 %v674_v36, %v674_v36  ;;  %v1284_v43 = vcombine.high %v2094_v44, %v2094_v44 }
 0x332   : > { %v1497_v19 = vpop.permute.xlu1 %1496  ;;  %v980_v37 = vpack.c.bf16 %v678_v30, %v675_v28  ;;  %v1502_v38 = vpop.permute.xlu0 %1501  ;;  %v981_v11 = vpack.c.bf16 %v679_v46, %v676_v42  ;;  %v1283_v46 = vcombine.low %v2094_v44, %v2094_v44 }
 0x333   : > { %1079 = vrot.lane.b32.xlu1 %v996_v2, %s1608_s8  ;;  %v1499_v13 = vunpack.i.h.bf16 %v1497_v19  ;;  %v1503_v41 = vunpack.i.l.bf16 %v1502_v38  ;;  %v1498_v58 = vunpack.i.l.bf16 %v1497_v19  ;;  %v1504_v48 = vunpack.i.h.bf16 %v1502_v38  ;;  %1285 = vmatprep.mubr.msk.bf16.mxu1 %vm1135_vm14, %v1284_v43 }
 0x334   : > { %1077 = vrot.lane.b32.xlu0 %v995_v5, %s1608_s8 }
 0x335   : > { %v969_v50 = vsel %vm484_vm5, %v1499_v13, %v1503_v41  ;;  %v968_v53 = vsel %vm484_vm5, %v1498_v58, %v1499_v13  ;;  %v1003_v57 = vpack.c.bf16 %v1504_v48, %v1498_v58 }
 0x336   : > { %v1507_v34 = vpop.permute.xlu1 %1506 }
 0x337   : > { %1057 = vrot.lane.b32.xlu1 %v985_v12, %s1608_s8  ;;  %v1509_v39 = vunpack.i.h.bf16 %v1507_v34  ;;  %v1508_v40 = vunpack.i.l.bf16 %v1507_v34 }
 0x338   : > { %1061 = vrot.lane.b32.xlu0 %v987_v47, %s1608_s8 }
 0x339   : > { %v971_v49 = vsel %vm484_vm5, %v1508_v40, %v1509_v39  ;;  %v970_v61 = vsel %vm484_vm5, %v1504_v48, %v1508_v40 }
 0x33a   : > { %v1005_v55 = vpack.c.bf16 %v971_v49, %v969_v50  ;;  %v1004_v10 = vpack.c.bf16 %v970_v61, %v968_v53 }
 0x33b   : > { %1055 = vrot.lane.b32.xlu1 %v984_v18, %s1608_s8 }
 0x33c   : > { %1065 = vrot.lane.b32.xlu0 %v989_v24, %s1608_s8 }
 0x33f   : > { %1059 = vrot.lane.b32.xlu1 %v986_v25, %s1608_s8 }
 0x340   : > { %1053 = vrot.lane.b32.xlu0 %v983_v33, %s1608_s8 }
 0x343   : > { %1047 = vrot.lane.b32.xlu1 %v980_v37, %s1608_s8 }
 0x344   : > { %1051 = vrot.lane.b32.xlu0 %v982_v35, %s1608_s8 }
 0x347   : > { %1045 = vrot.lane.b32.xlu1 %v979_v45, %s1608_s8 }
 0x348   : > { %1049 = vrot.lane.b32.xlu0 %v981_v11, %s1608_s8 }
 0x34b   : > { %1097 = vrot.lane.b32.xlu1 %v1005_v55, %s1608_s8 }
 0x34c   : > { %1095 = vrot.lane.b32.xlu0 %v1004_v10, %s1608_s8 }
 0x34f   : > { %1009 = vperm.xlu1 %1394, %v1006_v56  }
 0x350   : > { %1093 = vrot.lane.b32.xlu0 %v1003_v57, %s1608_s8  ;;  %s1292_s8 = sshll.u32 %s1679_s25, 8  ;;  %s1622_s25 = smov [#allocation7]  }
 0x351   : > { %s2136_s15 = scalar_lea.hbm %s2179_s6, %s1292_s8  ;;  %s1545_s16 = sshll.u32 %s1622_s25, 4  ;;  %s1546_s16 = int_to_ptr.vmem [resolvable:$false] %s1545_s16 }
 0x352   : > { %s1547_s14 = scalar_lea.vmem %s1546_s16, 512  ;;  %p1548_p3 = scmp.lt.s32.totalorder %s1200_s12, %s1546_s16 }
 0x353   : > { %p1549_p5 = scmp.lt.s32.totalorder %s1547_s14, %s1541_s19 }
 0x355   : > { %p1550_p8 = por %p1549_p5, %p1548_p3 }
 0x357   : > { %p1551_p10 = pnand %p1550_p8, %p1544_p1 }
 0x381   : > { %v1088_v59 = vpop.permute.xlu0 %1087 }
 0x389   : > { %v1076_v60 = vpop.permute.xlu0 %1075 }
 0x38d   : > { %v1070_v62 = vpop.permute.xlu1 %1069  ;;  %v1074_v63 = vpop.permute.xlu0 %1073 }
 0x391   : > { %v1082_v3 = vpop.permute.xlu1 %1081  ;;  %v1090_v2 = vpop.permute.xlu0 %1089 }
 0x392   : > { %v1113_v4 = vsel %vm370_vm0, %v1088_v59, %v1090_v2 }
 0x395   : > { %v1092_v0 = vpop.permute.xlu1 %1091 }
 0x396   : > { %v1114_v1 = vsel %vm370_vm0, %v1090_v2, %v1092_v0 }
 0x397   : > { %1139 = vmatprep.subr.bf16.mxu1 %v1114_v1 }
 0x398   : > { %1140 = vmatpush1.bf16.msra.mxu1 %v1113_v4 }
 0x399   : > { %v1072_v5 = vpop.permute.xlu1 %1071 }
 0x39a   : > { %v1108_v17 = vsel %vm370_vm0, %v1072_v5, %v1074_v63  ;;  %v1107_v18 = vsel %vm370_vm0, %v1070_v62, %v1072_v5 }
 0x39d   : > { %v1068_v51 = vpop.permute.xlu1 %1067 }
 0x39e   : > { %v1064_v7 = vpop.permute.xlu0 %1063 }
 0x3a1   : > { %v1084_v54 = vpop.permute.xlu1 %1083 }
 0x3a2   : > { %v1086_v8 = vpop.permute.xlu0 %1085  ;;  %v1111_v12 = vsel %vm370_vm0, %v1082_v3, %v1084_v54 }
 0x3a3   : > { %v1112_v9 = vsel %vm370_vm0, %v1084_v54, %v1086_v8 }
 0x3a4   : > { %1141 = vmatprep.subr.bf16.mxu1 %v1112_v9 }
 0x3a5   : > { %1142 = vmatpush1.bf16.msra.mxu1 %v1111_v12  ;;  %v1080_v47 = vpop.permute.xlu1 %1079 }
 0x3a6   : > { %v1078_v52 = vpop.permute.xlu0 %1077 }
 0x3a7   : > { %v1110_v14 = vsel %vm370_vm0, %v1078_v52, %v1080_v47  ;;  %v1109_v15 = vsel %vm370_vm0, %v1076_v60, %v1078_v52 }
 0x3a8   : > { %1143 = vmatprep.subr.bf16.mxu1 %v1110_v14 }
 0x3a9   : > { %1144 = vmatpush1.bf16.msra.mxu1 %v1109_v15  ;;  %v1058_v16 = vpop.permute.xlu1 %1057 }
 0x3aa   : > { %v1062_v6 = vpop.permute.xlu0 %1061  ;;  %1145 = vmatprep.subr.bf16.mxu1 %v1108_v17 }
 0x3ad   : > { %1146 = vmatpush1.bf16.msra.mxu1 %v1107_v18  ;;  %v1056_v19 = vpop.permute.xlu1 %1055 }
 0x3ae   : > { %v1066_v20 = vpop.permute.xlu0 %1065 }
 0x3af   : > { %v1106_v21 = vsel %vm370_vm0, %v1066_v20, %v1068_v51  ;;  %v1105_v22 = vsel %vm370_vm0, %v1064_v7, %v1066_v20 }
 0x3b0   : > { %1147 = vmatprep.subr.bf16.mxu1 %v1106_v21 }
 0x3b1   : > { %1148 = vmatpush1.bf16.msra.mxu1 %v1105_v22  ;;  %v1060_v23 = vpop.permute.xlu1 %1059 }
 0x3b2   : > { %v1054_v24 = vpop.permute.xlu0 %1053  ;;  %v1104_v26 = vsel %vm370_vm0, %v1060_v23, %v1062_v6  ;;  %v1103_v27 = vsel %vm370_vm0, %v1058_v16, %v1060_v23 }
 0x3b3   : > { %1149 = vmatprep.subr.bf16.mxu1 %v1104_v26  ;;  %v1102_v28 = vsel %vm370_vm0, %v1054_v24, %v1056_v19 }
 0x3b5   : > { %1150 = vmatpush1.bf16.msra.mxu1 %v1103_v27  ;;  %v1048_v25 = vpop.permute.xlu1 %1047 }
 0x3b6   : > { %v1052_v30 = vpop.permute.xlu0 %1051  ;;  %1151 = vmatprep.subr.bf16.mxu1 %v1102_v28 }
 0x3b7   : > { %v1101_v29 = vsel %vm370_vm0, %v1052_v30, %v1054_v24 }
 0x3b9   : > { %1152 = vmatpush1.bf16.msra.mxu1 %v1101_v29  ;;  %v1046_v31 = vpop.permute.xlu1 %1045 }
 0x3ba   : > { %v1050_v32 = vpop.permute.xlu0 %1049  ;;  %v1099_v34 = vsel %vm370_vm0, %v1046_v31, %v1048_v25 }
 0x3bb   : > { %v1100_v33 = vsel %vm370_vm0, %v1048_v25, %v1050_v32 }
 0x3bc   : > { %1153 = vmatprep.subr.bf16.mxu1 %v1100_v33 }
 0x3bd   : > { %1154 = vmatpush1.bf16.msra.mxu1 %v1099_v34  ;;  %v1098_v35 = vpop.permute.xlu1 %1097 }
 0x3be   : > { %v1096_v36 = vpop.permute.xlu0 %1095 }
 0x3bf   : > { %v1116_v37 = vsel %vm370_vm0, %v1096_v36, %v1098_v35 }
 0x3c0   : > { %1169 = vmatprep.subr.bf16.mxu1 %v1116_v37 }
 0x3c2   : > { %v1094_v38 = vpop.permute.xlu0 %1093 }
 0x3c3   : > { %v1115_v42 = vsel %vm370_vm0, %v1094_v38, %v1096_v36 }
 0x3c4   : > { %1170 = vmatpush2.bf16.msra.mxu1 %v1115_v42 }
 0x3c7   : > { %1172 = vmatmul.mubr.bf16.vlgmr.msra.gmra.mxu1 %v1283_v46 }
 0x3ca   : > { %v1010_v39 = vpop.permute.xlu1 %1009 }
 0x487   : > { %v1173_v40 = vpop.f32.mrf.mxu1 }
 0x488   : > { %v1174_v13 = vadd.f32 %v1173_v40, %v1010_v39 }
 0x489   : > { %v1175_v41 = vpop.f32.mrf.mxu1 }
 0x48a   : > { %v1180_v45 = vmax.f32 %v1174_v13, 0.0  ;;  %v1176_v58 = vadd.f32 %v1175_v41, %v1010_v39 }
 0x48b   : > { %v1177_v48 = vpop.f32.mrf.mxu1 }
 0x48c   : > { %1182 = vst [vmem:[%s267_s28] sm:$0xff] %v1180_v45  ;;  %v1181_v43 = vmax.f32 %v1176_v58, 0.0 }
 0x48d   : > { %v1178_v44 = vpop.f32.mrf.mxu1 }
 0x48e   : > { %1183 = vst [vmem:[%s267_s28 + $0x8] sm:$0xff] %v1181_v43 }
 0x48f   : > { %1554 = shalt.err (!%p1551_p10)
}
 0x490   : > { %s1555_s17 = scalar_lea.hbm %s2136_s15, 256  ;;  %s1559_s20 = scalar_lea.hbm %s2179_s6, 512 }
 0x491   : > { %p1556_p2 = scmp.ne.s32.totalorder %s2136_s15, %s1555_s17  ;;  %p1560_p7 = scmp.lt.s32.totalorder %s2136_s15, %s2179_s6 }
 0x492   : > { %p1561_p0 = scmp.lt.s32.totalorder %s1559_s20, %s1555_s17 }
 0x493   : > { %p1557_p4 = pnand %p1556_p2, %p2210_p12 }
 0x494   : > { %p1562_p6 = por %p1561_p0, %p1560_p7 }
 0x495   : > { %p1558_p9 = pneg %p1557_p4 }
 0x497   : > { %p1563_p11 = pnand %p1562_p6, %p1558_p9 }
 0x499   : > { %1566 = shalt.err (!%p1563_p11)
}
 0x49a   : > { %1295 = dma.vmem_to_hbm [thread:$0]  (%p2210_p12), %s1200_s12, 256, %s2136_s15, %s1185_s29  }
 0x49b PF: > { %s1211_s28 = sand.u32 1, %s1593_s21   ;;  %p2211_p13 = scmp.ne.s32.totalorder %s2198_s10, 0 }
 0x49c   : > { %p2212_p1 = scmp.ge.s32.totalorder %s1605_s24, 2  ;;  %s1212_s13 = scalar_lea.sflag [#allocation6], %s1211_s28 }
 0x49e   : > { %p1302_p3 = pnand %p2212_p1, %p2211_p13 }
 0x4a0   : > { %p1303_p5 = pneg %p1302_p3 }
 0x4a2   : > { %1588 = dma.done.wait (%p1303_p5), %s1212_s13, 256  }
 0x4a3   : > { %1590 = vsyncadd (%p1303_p5), %s1212_s13, 4294967040  ;;  %p19_p8 = scmp.ge.s32.totalorder %s1683_s27, 4   ;;  %s2213_s21 = smov %s1597_s22 }
 0x4a4   : > { %s2214_s22 = smov %s1601_s23  ;;  %s2215_s23 = smov %s1695_s30 }
 0x4a5   : > { %s2216_s24 = smov %s1683_s27  ;;  %21 = sbr.rel (!%p19_p8) target bundleno = 5 (0x5), region = 90 }
 0x4aa   :  { %1217 = vsyncpa [#allocation5], 1 }
 0x4ab   :  { %1219 = vsyncpa [#allocation5 + $0x1], 1 }
 0x4ac   :  { %1220 = vsyncpa [#allocation6], 1 }
 0x4ad   :  { %1222 = vsyncpa [#allocation6 + $0x1], 1 }

</bundles_post_ra>
